<compile_context>
chip_gen: v7x
topology: tpu7x:2x2x1
jax: 0.10.0
libtpu: 0.0.40
codegen_flags: <defaults>
</compile_context>

<pallas_src>
import jax
import jax.numpy as jnp
from jax.experimental import pallas as pl
from jax.experimental.pallas import tpu as pltpu


def _round_up(x, m):
    return (x + m - 1) // m * m


def _vmem_limit_bytes():
    """Per-generation VMEM budget with ~25% headroom (v7x = 64 MiB, v5e/v6e = 128 MiB)."""
    try:
        cap = pltpu.get_tpu_info().vmem_capacity_bytes
    except Exception:  # older jax without get_tpu_info
        cap = 64 << 20
    return min(int(cap * 3 // 4), 48 << 20)


# ----------------------------------------------------------------------------- kernels


def gin_layer_kernel(a_ref, x_ref, wa_ref, ba_ref, wb_ref, bb_ref, h_ref, acc_ref):
    """One GIN layer: h = relu( relu( (adj_hat @ x) @ Wa + ba ) @ Wb + bb ).

    grid = (row tiles, K tiles); K is the aggregation reduction axis (last, arbitrary).
    """
    k = pl.program_id(1)

    @pl.when(k == 0)
    def _():
        acc_ref[...] = jnp.zeros_like(acc_ref)

    # Aggregation tile: bf16 x bf16 -> f32 accumulate on the MXU.
    acc_ref[...] += jnp.dot(a_ref[...], x_ref[...],
                            preferred_element_type=jnp.float32)

    @pl.when(k == pl.num_programs(1) - 1)
    def _():
        agg = acc_ref[...]                                        # [TM, F] f32
        h = jnp.dot(agg.astype(jnp.bfloat16), wa_ref[...],
                    preferred_element_type=jnp.float32) + ba_ref[...]
        h = jnp.maximum(h, 0.0)                                   # ReLU inside nn*
        h = jnp.dot(h.astype(jnp.bfloat16), wb_ref[...],
                    preferred_element_type=jnp.float32) + bb_ref[...]
        h = jnp.maximum(h, 0.0)                                   # torch.relu after conv
        h_ref[...] = h.astype(h_ref.dtype)


def pool_head_kernel(p_ref, h_ref, wo_ref, bo_ref, out_ref):
    """pooled = P @ h (mean pool); out = pooled @ Wo + bo."""
    pooled = jnp.dot(p_ref[...], h_ref[...], preferred_element_type=jnp.float32)
    # TODO(synk): dropout(p=0.2) identity in inference mode.
    out_ref[...] = (jnp.dot(pooled.astype(jnp.bfloat16), wo_ref[...],
                            preferred_element_type=jnp.float32) + bo_ref[...])


# ------------------------------------------------------------------------ pallas calls


def gin_layer(adj_hat, x, wa, ba, wb, bb, *, tile, vmem_limit):
    n = adj_hat.shape[0]
    f = x.shape[1]
    h_dim = wb.shape[1]
    grid = (n // tile, n // tile)

    return pl.pallas_call(
        gin_layer_kernel,
        out_shape=jax.ShapeDtypeStruct((n, h_dim), jnp.bfloat16),
        grid_spec=pltpu.PrefetchScalarGridSpec(
            num_scalar_prefetch=0,
            grid=grid,
            in_specs=[
                pl.BlockSpec((tile, tile), lambda i, k: (i, k)),      # adj_hat tile
                pl.BlockSpec((tile, f), lambda i, k: (k, 0)),         # x K-strip
                pl.BlockSpec((f, h_dim), lambda i, k: (0, 0)),        # Wa (resident)
                pl.BlockSpec((1, h_dim), lambda i, k: (0, 0)),        # ba (resident)
                pl.BlockSpec((h_dim, h_dim), lambda i, k: (0, 0)),    # Wb (resident)
                pl.BlockSpec((1, h_dim), lambda i, k: (0, 0)),        # bb (resident)
            ],
            out_specs=pl.BlockSpec((tile, h_dim), lambda i, k: (i, 0)),
            scratch_shapes=[pltpu.VMEM((tile, f), jnp.float32)],
        ),
        compiler_params=pltpu.CompilerParams(
            dimension_semantics=("parallel", "arbitrary"),
            vmem_limit_bytes=vmem_limit,
        ),
    )(adj_hat, x, wa, ba, wb, bb)


def pool_head(pool, h, wo, bo, *, vmem_limit):
    g_pad, n_pad = pool.shape
    h_dim = wo.shape[1]
    return pl.pallas_call(
        pool_head_kernel,
        out_shape=jax.ShapeDtypeStruct((g_pad, h_dim), jnp.float32),
        grid=(),
        in_specs=[
            pl.BlockSpec((g_pad, n_pad), lambda: (0, 0)),
            pl.BlockSpec((n_pad, h_dim), lambda: (0, 0)),
            pl.BlockSpec((h_dim, h_dim), lambda: (0, 0)),
            pl.BlockSpec((1, h_dim), lambda: (0, 0)),
        ],
        out_specs=pl.BlockSpec((g_pad, h_dim), lambda: (0, 0)),
        compiler_params=pltpu.CompilerParams(vmem_limit_bytes=vmem_limit),
    )(pool, h, wo, bo)


# ----------------------------------------------------------------------------- wrapper


def ligand_gcn_forward(x, edge_index, batch, params, num_graphs):
    n_nodes, f_in = x.shape
    hidden = params["w2"].shape[1]
    bf16, f32 = jnp.bfloat16, jnp.float32

    # Padded, MXU-aligned sizes.
    n_pad = _round_up(max(n_nodes, 128), 128)
    tile = 256 if n_pad % 256 == 0 else 128      # 256-row tiles feed the 256-wide MXU (v6e/v7x)
    f_pad = _round_up(max(f_in, 128), 128)
    g_pad = _round_up(max(num_graphs, 8), 8)
    vmem_limit = _vmem_limit_bytes()

    # adj_hat = A + (1 + eps) * I  (eps = 0), A[dst, src] = #edges src->dst.
    src, dst = edge_index[0], edge_index[1]
    adj = jnp.zeros((n_pad, n_pad), f32)
    adj = adj.at[dst, src].add(1.0)
    diag = jnp.arange(n_nodes)
    adj = adj.at[diag, diag].add(1.0)
    adj_hat = adj.astype(bf16)                               # exact: small integer degrees

    # Zero-padded node features (14 -> 128 lanes).
    x_pad = jnp.zeros((n_pad, f_pad), bf16).at[:n_nodes, :f_in].set(x.astype(bf16))

    # Mean-pool matrix P[g, n] = 1/|graph g| if batch[n] == g else 0 (padded nodes -> 0).
    batch_pad = jnp.concatenate(
        [batch.astype(jnp.int32), jnp.full((n_pad - n_nodes,), -1, jnp.int32)])
    one_hot = (batch_pad[None, :] == jnp.arange(g_pad)[:, None]).astype(f32)
    counts = jnp.maximum(one_hot.sum(axis=1, keepdims=True), 1.0)
    pool = (one_hot / counts).astype(bf16)                   # [g_pad, n_pad]

    # Weights: bf16 MXU inputs (w1 zero-padded along the padded feature rows), f32 biases.
    w1 = jnp.zeros((f_pad, hidden), bf16).at[:f_in].set(params["w1"].astype(bf16))
    w2 = params["w2"].astype(bf16)
    w3 = params["w3"].astype(bf16)
    w4 = params["w4"].astype(bf16)
    wo = params["wo"].astype(bf16)
    b1, b2, b3, b4, bo = (params[k].astype(f32) for k in ("b1", "b2", "b3", "b4", "bo"))

    h1 = gin_layer(adj_hat, x_pad, w1, b1, w2, b2, tile=tile, vmem_limit=vmem_limit)
    h2 = gin_layer(adj_hat, h1, w3, b3, w4, b4, tile=tile, vmem_limit=vmem_limit)
    out = pool_head(pool, h2, wo, bo, vmem_limit=vmem_limit)
    return out[:num_graphs]


# -------------------------------------------------------------------- params & reference


def init_params(key, input_dim=14, hidden_dim=128):
    ks = jax.random.split(key, 10)
    s = 0.1

    def lin(k, fan_in, fan_out):
        return s * jax.random.normal(k, (fan_in, fan_out), jnp.float32)

    return {
        "w1": lin(ks[0], input_dim, hidden_dim),
        "b1": s * jax.random.normal(ks[1], (1, hidden_dim), jnp.float32),
        "w2": lin(ks[2], hidden_dim, hidden_dim),
        "b2": s * jax.random.normal(ks[3], (1, hidden_dim), jnp.float32),
        "w3": lin(ks[4], hidden_dim, hidden_dim),
        "b3": s * jax.random.normal(ks[5], (1, hidden_dim), jnp.float32),
        "w4": lin(ks[6], hidden_dim, hidden_dim),
        "b4": s * jax.random.normal(ks[7], (1, hidden_dim), jnp.float32),
        "wo": lin(ks[8], hidden_dim, hidden_dim),
        "bo": s * jax.random.normal(ks[9], (1, hidden_dim), jnp.float32),
    }


def reference_forward(x, edge_index, batch, params, num_graphs):
    """Pure-JAX reference mirroring the kernel's bf16-input / f32-accumulate math."""
    f32, bf16 = jnp.float32, jnp.bfloat16
    n = x.shape[0]
    src, dst = edge_index[0], edge_index[1]
    adj_hat = (jnp.zeros((n, n), f32).at[dst, src].add(1.0)
               + jnp.eye(n, dtype=f32)).astype(bf16)

    def mm(a, b):
        return jnp.dot(a.astype(bf16), b.astype(bf16), preferred_element_type=f32)

    def gin(h, wa, ba, wb, bb):
        agg = mm(adj_hat, h)
        z = jnp.maximum(mm(agg, wa) + ba, 0.0)
        z = jnp.maximum(mm(z, wb) + bb, 0.0)
        return z.astype(bf16)

    h = gin(x, params["w1"], params["b1"], params["w2"], params["b2"])
    h = gin(h, params["w3"], params["b3"], params["w4"], params["b4"])

    one_hot = (batch[None, :] == jnp.arange(num_graphs)[:, None]).astype(f32)
    pool = (one_hot / jnp.maximum(one_hot.sum(1, keepdims=True), 1.0)).astype(bf16)
    pooled = mm(pool, h)
    return mm(pooled, params["wo"]) + params["bo"]


# --------------------------------------------------------------------------------- main


if __name__ == "__main__":
    INPUT_DIM = 14
    HIDDEN = 128
    N_NODES = 16          # two graphs of 8 nodes each
    N_GRAPHS = 2

    key = jax.random.PRNGKey(0)
    k_feat, k_param = jax.random.split(key)

    x = jax.random.normal(k_feat, (N_NODES, INPUT_DIM), jnp.float32)

    def ring_edges(offset, n):
        s = jnp.arange(n) + offset
        d = (jnp.arange(n) + 1) % n + offset
        return jnp.stack([jnp.concatenate([s, d]), jnp.concatenate([d, s])])

    edge_index = jnp.concatenate([ring_edges(0, 8), ring_edges(8, 8)], axis=1)
    batch = jnp.concatenate([jnp.zeros(8, jnp.int32), jnp.ones(8, jnp.int32)])

    params = init_params(k_param, INPUT_DIM, HIDDEN)

    out = ligand_gcn_forward(x, edge_index, batch, params, N_GRAPHS)
    out = jax.block_until_ready(out)

    ref = reference_forward(x, edge_index, batch, params, N_GRAPHS)
    assert out.shape == (N_GRAPHS, HIDDEN), out.shape
    assert jnp.allclose(out, ref, atol=1e-2, rtol=1e-2), "mismatch vs reference"

    print("KERNEL_OK")
</pallas_src>

<mosaic_0001>
module attributes {stable_mosaic.version = 11 : i64} {
  func.func @gin_layer_kernel(%arg0: i32, %arg1: i32, %arg2: memref<128x128xbf16, #tpu.memory_space<vmem>>, %arg3: memref<128x128xbf16, #tpu.memory_space<vmem>>, %arg4: memref<128x128xbf16, #tpu.memory_space<vmem>>, %arg5: memref<1x128xf32, #tpu.memory_space<vmem>>, %arg6: memref<128x128xbf16, #tpu.memory_space<vmem>>, %arg7: memref<1x128xf32, #tpu.memory_space<vmem>>, %arg8: memref<128x128xbf16, #tpu.memory_space<vmem>>, %arg9: memref<128x128xf32, #tpu.memory_space<vmem>>) attributes {dimension_semantics = [#tpu.dimension_semantics<parallel>, #tpu.dimension_semantics<arbitrary>], iteration_bounds = array<i64: 1, 1>, scalar_prefetch = 0 : i64, scratch_operands = 1 : i64, tpu.core_type = #tpu.core_type<tc>, window_params = [{transform_indices = @transform_0, window_bounds = array<i64: 128, 128>}, {transform_indices = @transform_1, window_bounds = array<i64: 128, 128>}, {pipeline_mode = #tpu.pipeline_mode<synchronous>, transform_indices = @transform_2, window_bounds = array<i64: 128, 128>}, {pipeline_mode = #tpu.pipeline_mode<synchronous>, transform_indices = @transform_3, window_bounds = array<i64: 1, 128>}, {pipeline_mode = #tpu.pipeline_mode<synchronous>, transform_indices = @transform_4, window_bounds = array<i64: 128, 128>}, {pipeline_mode = #tpu.pipeline_mode<synchronous>, transform_indices = @transform_5, window_bounds = array<i64: 1, 128>}, {transform_indices = @transform_6, window_bounds = array<i64: 128, 128>}]} {
    %c0_i32 = arith.constant 0 : i32
    %0 = arith.cmpi eq, %arg1, %c0_i32 : i32
    %1 = arith.extui %0 : i1 to i32
    %c0_i32_0 = arith.constant 0 : i32
    %2 = arith.cmpi ne, %1, %c0_i32_0 : i32
    scf.if %2 {
      %cst_10 = arith.constant 0.000000e+00 : f32
      %12 = vector.broadcast %cst_10 : f32 to vector<128x128xf32>
      %c0_11 = arith.constant 0 : index
      %c0_12 = arith.constant 0 : index
      %13 = vector.load %arg9[%c0_11, %c0_12] : memref<128x128xf32, #tpu.memory_space<vmem>>, vector<128x128xf32>
      tpu.vector_store %arg9[%c0_11, %c0_12], %12 {strides = array<i32>} : memref<128x128xf32, #tpu.memory_space<vmem>>, vector<128x128xf32>,
    } else {
    }
    %c0 = arith.constant 0 : index
    %c0_1 = arith.constant 0 : index
    %3 = vector.load %arg9[%c0, %c0_1] : memref<128x128xf32, #tpu.memory_space<vmem>>, vector<128x128xf32>
    %c0_2 = arith.constant 0 : index
    %c0_3 = arith.constant 0 : index
    %4 = vector.load %arg2[%c0_2, %c0_3] : memref<128x128xbf16, #tpu.memory_space<vmem>>, vector<128x128xbf16>
    %c0_4 = arith.constant 0 : index
    %c0_5 = arith.constant 0 : index
    %5 = vector.load %arg3[%c0_4, %c0_5] : memref<128x128xbf16, #tpu.memory_space<vmem>>, vector<128x128xbf16>
    %cst = arith.constant dense<0.000000e+00> : vector<128x128xf32>
    %6 = tpu.matmul %4, %5, %cst {dimension_numbers = #tpu.dot_dimension_numbers<[1], [0], [0], [1], [0, 0, 1, 1], [], []>} : vector<128x128xbf16>, vector<128x128xbf16>, vector<128x128xf32> -> vector<128x128xf32>
    %7 = arith.addf %3, %6 : vector<128x128xf32>
    %c0_6 = arith.constant 0 : index
    %c0_7 = arith.constant 0 : index
    %8 = vector.load %arg9[%c0_6, %c0_7] : memref<128x128xf32, #tpu.memory_space<vmem>>, vector<128x128xf32>
    tpu.vector_store %arg9[%c0_6, %c0_7], %7 {strides = array<i32>} : memref<128x128xf32, #tpu.memory_space<vmem>>, vector<128x128xf32>,
    %c0_i32_8 = arith.constant 0 : i32
    %9 = arith.cmpi eq, %arg1, %c0_i32_8 : i32
    %10 = arith.extui %9 : i1 to i32
    %c0_i32_9 = arith.constant 0 : i32
    %11 = arith.cmpi ne, %10, %c0_i32_9 : i32
    scf.if %11 {
      %c0_10 = arith.constant 0 : index
      %c0_11 = arith.constant 0 : index
      %12 = vector.load %arg9[%c0_10, %c0_11] : memref<128x128xf32, #tpu.memory_space<vmem>>, vector<128x128xf32>
      %13 = arith.truncf %12 : vector<128x128xf32> to vector<128x128xbf16>
      %c0_12 = arith.constant 0 : index
      %c0_13 = arith.constant 0 : index
      %14 = vector.load %arg4[%c0_12, %c0_13] : memref<128x128xbf16, #tpu.memory_space<vmem>>, vector<128x128xbf16>
      %cst_14 = arith.constant dense<0.000000e+00> : vector<128x128xf32>
      %15 = tpu.matmul %13, %14, %cst_14 {dimension_numbers = #tpu.dot_dimension_numbers<[1], [0], [0], [1], [0, 0, 1, 1], [], []>} : vector<128x128xbf16>, vector<128x128xbf16>, vector<128x128xf32> -> vector<128x128xf32>
      %c0_15 = arith.constant 0 : index
      %c0_16 = arith.constant 0 : index
      %16 = vector.load %arg5[%c0_15, %c0_16] : memref<1x128xf32, #tpu.memory_space<vmem>>, vector<1x128xf32>
      %17 = vector.broadcast %16 : vector<1x128xf32> to vector<128x128xf32>
      %18 = arith.addf %15, %17 : vector<128x128xf32>
      %cst_17 = arith.constant 0.000000e+00 : f32
      %19 = vector.broadcast %cst_17 : f32 to vector<128x128xf32>
      %20 = arith.maximumf %18, %19 : vector<128x128xf32>
      %21 = arith.truncf %20 : vector<128x128xf32> to vector<128x128xbf16>
      %c0_18 = arith.constant 0 : index
      %c0_19 = arith.constant 0 : index
      %22 = vector.load %arg6[%c0_18, %c0_19] : memref<128x128xbf16, #tpu.memory_space<vmem>>, vector<128x128xbf16>
      %cst_20 = arith.constant dense<0.000000e+00> : vector<128x128xf32>
      %23 = tpu.matmul %21, %22, %cst_20 {dimension_numbers = #tpu.dot_dimension_numbers<[1], [0], [0], [1], [0, 0, 1, 1], [], []>} : vector<128x128xbf16>, vector<128x128xbf16>, vector<128x128xf32> -> vector<128x128xf32>
      %c0_21 = arith.constant 0 : index
      %c0_22 = arith.constant 0 : index
      %24 = vector.load %arg7[%c0_21, %c0_22] : memref<1x128xf32, #tpu.memory_space<vmem>>, vector<1x128xf32>
      %25 = vector.broadcast %24 : vector<1x128xf32> to vector<128x128xf32>
      %26 = arith.addf %23, %25 : vector<128x128xf32>
      %cst_23 = arith.constant 0.000000e+00 : f32
      %27 = vector.broadcast %cst_23 : f32 to vector<128x128xf32>
      %28 = arith.maximumf %26, %27 : vector<128x128xf32>
      %29 = arith.truncf %28 : vector<128x128xf32> to vector<128x128xbf16>
      %c0_24 = arith.constant 0 : index
      %c0_25 = arith.constant 0 : index
      %30 = vector.load %arg8[%c0_24, %c0_25] : memref<128x128xbf16, #tpu.memory_space<vmem>>, vector<128x128xbf16>
      tpu.vector_store %arg8[%c0_24, %c0_25], %29 {strides = array<i32>} : memref<128x128xbf16, #tpu.memory_space<vmem>>, vector<128x128xbf16>,
    } else {
    }
    return
  }
  func.func @transform_0(%arg0: i32, %arg1: i32) -> (i32, i32) {
    %c0_i32 = arith.constant 0 : i32
    return %arg0, %arg1 : i32, i32
  }
  func.func @transform_1(%arg0: i32, %arg1: i32) -> (i32, i32) {
    %c0_i32 = arith.constant 0 : i32
    %c0_i32_0 = arith.constant 0 : i32
    return %arg1, %c0_i32 : i32, i32
  }
  func.func @transform_2(%arg0: i32, %arg1: i32) -> (i32, i32) {
    %c0_i32 = arith.constant 0 : i32
    %c0_i32_0 = arith.constant 0 : i32
    %c0_i32_1 = arith.constant 0 : i32
    return %c0_i32, %c0_i32_0 : i32, i32
  }
  func.func @transform_3(%arg0: i32, %arg1: i32) -> (i32, i32) {
    %c0_i32 = arith.constant 0 : i32
    %c0_i32_0 = arith.constant 0 : i32
    %c0_i32_1 = arith.constant 0 : i32
    return %c0_i32, %c0_i32_0 : i32, i32
  }
  func.func @transform_4(%arg0: i32, %arg1: i32) -> (i32, i32) {
    %c0_i32 = arith.constant 0 : i32
    %c0_i32_0 = arith.constant 0 : i32
    %c0_i32_1 = arith.constant 0 : i32
    return %c0_i32, %c0_i32_0 : i32, i32
  }
  func.func @transform_5(%arg0: i32, %arg1: i32) -> (i32, i32) {
    %c0_i32 = arith.constant 0 : i32
    %c0_i32_0 = arith.constant 0 : i32
    %c0_i32_1 = arith.constant 0 : i32
    return %c0_i32, %c0_i32_0 : i32, i32
  }
  func.func @transform_6(%arg0: i32, %arg1: i32) -> (i32, i32) {
    %c0_i32 = arith.constant 0 : i32
    %c0_i32_0 = arith.constant 0 : i32
    return %arg0, %c0_i32 : i32, i32
  }
}

</mosaic_0001>

<bundles_post_ra>
// kernel: tpu_custom_call.1
= control target key start
LH: loop header
LB: loop body
LE: loop exit
PB: predicated region body
PF: predicated region fallthrough
CT: control target
= control target key end

     0   :  { %11 = vsyncpa [#allocation4], 0  ;;  %s1442_s0 = inlined_call_operand.hbm [shape: bf16[128,128], index: 0, kind: input, shape index: {}]   ;;  %s1443_s1 = inlined_call_operand.hbm [shape: bf16[128,128], index: 1, kind: input, shape index: {}]   ;;  %s1444_s2 = inlined_call_operand.hbm [shape: bf16[128,128], index: 2, kind: input, shape index: {}]   ;;  %s1445_s3 = inlined_call_operand.vmem [shape: f32[1,128], index: 3, kind: input, shape index: {}]   ;;  %s1446_s4 = inlined_call_operand.hbm [shape: bf16[128,128], index: 4, kind: input, shape index: {}]   ;;  %s1447_s5 = inlined_call_operand.vmem [shape: f32[1,128], index: 5, kind: input, shape index: {}]   ;;  %s1448_s6 = inlined_call_operand.hbm [shape: bf16[128,128], index: 6, kind: output, shape index: {}]  }
   0x1   :  { %12 = vsyncpa [#allocation7], 0 }
   0x2   :  { %13 = vsyncpa [#allocation10], 0 }
   0x3   :  { %14 = vsyncpa [#allocation5], 0  ;;  %s1305_s21 = smov [#allocation6]   ;;  %s1306_s23 = smov [#allocation3]  }
   0x4   :  { %s32_s22 = sshll.u32 %s1305_s21, 4  ;;  %s20_s24 = sshll.u32 %s1306_s23, 4  ;;  %s33_s22 = int_to_ptr.vmem [resolvable:$true] %s32_s22  ;;  %s1347_s24 = int_to_ptr.vmem [resolvable:$true] %s20_s24 }
   0x5   :  { %s1187_s27 = scalar_lea.hbm %s1443_s1, 1024 }
   0x6   :  { %p1188_p0 = scmp.ne.s32.totalorder %s1443_s1, %s1187_s27  ;;  %p1191_p1 = scmp.lt.u32.totalorder %s1187_s27, %s1443_s1 }
   0x8   :  { %p1193_p2 = pnand %p1191_p1, %p1188_p0 }
   0xa   :  { %1196 = shalt.err (!%p1193_p2)
}
   0xb   :  { %s1197_s8 = scalar_lea.vmem %s33_s22, 1024  ;;  %p1202_p4 = scmp.lt.s32.totalorder %s33_s22, %s33_s22 }
   0xc   :  { %p1198_p3 = scmp.ne.s32.totalorder %s33_s22, %s1197_s8  ;;  %p1203_p5 = scmp.lt.s32.totalorder %s1197_s8, %s1197_s8 }
   0xe   :  { %p1204_p6 = por %p1203_p5, %p1202_p4 }
  0x10   :  { %p1205_p7 = pnand %p1204_p6, %p1198_p3 }
  0x12   :  { %1208 = shalt.err (!%p1205_p7)
}
  0x13   :  { %s1307_s9 = smov 64   ;;  %s1308_s10 = smov 4  }
  0x14   :  { %38 = dma.hbm_to_vmem [thread:$0]  %s1443_s1, 1024, %s33_s22, [#allocation7], %s1307_s9, %s1307_s9, %s1308_s10  }
  0x15   :  { %s1209_s15 = scalar_lea.hbm %s1442_s0, 1024 }
  0x16   :  { %p1210_p8 = scmp.ne.s32.totalorder %s1442_s0, %s1209_s15  ;;  %p1213_p9 = scmp.lt.u32.totalorder %s1209_s15, %s1442_s0 }
  0x18   :  { %p1215_p10 = pnand %p1213_p9, %p1210_p8 }
  0x1a   :  { %1218 = shalt.err (!%p1215_p10)
}
  0x1b   :  { %s1219_s20 = scalar_lea.vmem %s1347_s24, 1024  ;;  %p1224_p12 = scmp.lt.s32.totalorder %s1347_s24, %s1347_s24 }
  0x1c   :  { %p1220_p11 = scmp.ne.s32.totalorder %s1347_s24, %s1219_s20  ;;  %p1225_p13 = scmp.lt.s32.totalorder %s1219_s20, %s1219_s20 }
  0x1e   :  { %p1226_p0 = por %p1225_p13, %p1224_p12 }
  0x20   :  { %p1227_p1 = pnand %p1226_p0, %p1220_p11 }
  0x22   :  { %1230 = shalt.err (!%p1227_p1)
}
  0x23   :  { %26 = dma.hbm_to_vmem [thread:$0]  %s1442_s0, 1024, %s1347_s24, [#allocation4], %s1307_s9, %s1307_s9, %s1308_s10  }
  0x24   :  { %s1309_s22 = smov [#allocation8]   ;;  %s1310_s25 = smov [#allocation9]  }
  0x25   :  { %s44_s23 = sshll.u32 %s1309_s22, 4  ;;  %s58_s26 = sshll.u32 %s1310_s25, 4  ;;  %s45_s23 = int_to_ptr.vmem [resolvable:$true] %s44_s23  ;;  %s1384_s26 = int_to_ptr.vmem [resolvable:$true] %s58_s26 }
  0x26   :  { %s1231_s29 = scalar_lea.hbm %s1444_s2, 1024 }
  0x27   :  { %p1232_p2 = scmp.ne.s32.totalorder %s1444_s2, %s1231_s29  ;;  %p1235_p3 = scmp.lt.u32.totalorder %s1231_s29, %s1444_s2 }
  0x29   :  { %p1237_p4 = pnand %p1235_p3, %p1232_p2 }
  0x2b   :  { %1240 = shalt.err (!%p1237_p4)
}
  0x2c   :  { %s1241_s0 = scalar_lea.vmem %s45_s23, 1024  ;;  %p1246_p6 = scmp.lt.s32.totalorder %s45_s23, %s45_s23 }
  0x2d   :  { %p1242_p5 = scmp.ne.s32.totalorder %s45_s23, %s1241_s0  ;;  %p1247_p7 = scmp.lt.s32.totalorder %s1241_s0, %s1241_s0 }
  0x2f   :  { %p1248_p8 = por %p1247_p7, %p1246_p6 }
  0x31   :  { %p1249_p9 = pnand %p1248_p8, %p1242_p5 }
  0x33   :  { %1252 = shalt.err (!%p1249_p9)
}
  0x34   :  { %50 = dma.hbm_to_vmem [thread:$0]  %s1444_s2, 1024, %s45_s23, [#allocation7], %s1307_s9, %s1307_s9, %s1308_s10  }
  0x35   :  { %s1253_s15 = scalar_lea.hbm %s1446_s4, 1024 }
  0x36   :  { %p1254_p10 = scmp.ne.s32.totalorder %s1446_s4, %s1253_s15  ;;  %p1257_p11 = scmp.lt.u32.totalorder %s1253_s15, %s1446_s4 }
  0x38   :  { %p1259_p12 = pnand %p1257_p11, %p1254_p10 }
  0x3a   :  { %1262 = shalt.err (!%p1259_p12)
}
  0x3b   :  { %s1263_s20 = scalar_lea.vmem %s1384_s26, 1024  ;;  %p1268_p0 = scmp.lt.s32.totalorder %s1384_s26, %s1384_s26 }
  0x3c   :  { %p1264_p13 = scmp.ne.s32.totalorder %s1384_s26, %s1263_s20  ;;  %p1269_p1 = scmp.lt.s32.totalorder %s1263_s20, %s1263_s20 }
  0x3e   :  { %p1270_p2 = por %p1269_p1, %p1268_p0 }
  0x40   :  { %p1271_p3 = pnand %p1270_p2, %p1264_p13 }
  0x42   :  { %1274 = shalt.err (!%p1271_p3)
}
  0x43   :  { %64 = dma.hbm_to_vmem [thread:$0]  %s1446_s4, 1024, %s1384_s26, [#allocation10], %s1307_s9, %s1307_s9, %s1308_s10  }
  0x44   :  { %1297 = dma.done.wait [#allocation4], 1024  }
  0x45   :  { %1298 = vsyncadd [#allocation4], 4294966272 }
  0x46   :  { %1299 = dma.done.wait [#allocation7], 2048  }
  0x47   :  { %1300 = vsyncadd [#allocation7], 4294965248 }
  0x48   :  { %1301 = dma.done.wait [#allocation10], 1024  }
  0x49   :  { %1302 = vsyncadd [#allocation10], 4294966272  ;;  %v1155_v0 = vld [vmem:[#allocation6] sm:$0xff]   ;;  %v1156_v1 = vld [vmem:[#allocation6 + $0x8] sm:$0xff]  }
  0x4a   :  { %1036 = vmatprep.subr.bf16.mxu0 %v1155_v0  ;;  %v1157_v2 = vld [vmem:[#allocation6 + $0x10] sm:$0xff]   ;;  %v1158_v3 = vld [vmem:[#allocation6 + $0x18] sm:$0xff]   ;;  %v1163_v4 = vld [vmem:[#allocation3] sm:$0xff]  }
  0x4b   :  { %1037 = vmatpush3.bf16.msra.mxu0 %v1155_v0  ;;  %1052 = vmatprep.mubr.bf16.mxu0 %v1163_v4  ;;  %v1159_v5 = vld [vmem:[#allocation6 + $0x20] sm:$0xff]   ;;  %v1160_v6 = vld [vmem:[#allocation6 + $0x28] sm:$0xff]   ;;  %v1161_v9 = vld [vmem:[#allocation6 + $0x30] sm:$0xff]  }
  0x4c   :  { %1038 = vmatprep.subr.bf16.mxu0 %v1156_v1  ;;  %v1171_v7 = vld [vmem:[#allocation8] sm:$0xff]   ;;  %v1172_v8 = vld [vmem:[#allocation8 + $0x8] sm:$0xff]   ;;  %v1173_v10 = vld [vmem:[#allocation8 + $0x10] sm:$0xff]  }
  0x4d   :  { %1068 = vmatprep.subr.bf16.mxu1 %v1171_v7  ;;  %v1162_v11 = vld [vmem:[#allocation6 + $0x38] sm:$0xff]   ;;  %v1175_v13 = vld [vmem:[#allocation8 + $0x20] sm:$0xff]   ;;  %v1164_v14 = vld [vmem:[#allocation3 + $0x8] sm:$0xff]  }
  0x4e   :  { %1069 = vmatpush3.bf16.msra.mxu1 %v1171_v7  ;;  %v1174_v12 = vld [vmem:[#allocation8 + $0x18] sm:$0xff]   ;;  %v1165_v15 = vld [vmem:[#allocation3 + $0x10] sm:$0xff]   ;;  %v1176_v16 = vld [vmem:[#allocation8 + $0x28] sm:$0xff]  }
  0x4f   :  { %1039 = vmatpush3.bf16.msra.mxu0 %v1156_v1  ;;  %1070 = vmatprep.subr.bf16.mxu1 %v1172_v8  ;;  %v1177_v17 = vld [vmem:[#allocation8 + $0x30] sm:$0xff]   ;;  %v1166_v18 = vld [vmem:[#allocation3 + $0x18] sm:$0xff]   ;;  %v1167_v19 = vld [vmem:[#allocation3 + $0x20] sm:$0xff]  }
  0x50   :  { %1040 = vmatprep.subr.bf16.mxu0 %v1157_v2  ;;  %v1168_v20 = vld [vmem:[#allocation3 + $0x28] sm:$0xff]   ;;  %v1169_v21 = vld [vmem:[#allocation3 + $0x30] sm:$0xff]   ;;  %v1170_v22 = vld [vmem:[#allocation3 + $0x38] sm:$0xff]  }
  0x51   :  { %v1178_v23 = vld [vmem:[#allocation8 + $0x38] sm:$0xff]   ;;  %v1179_v24 = vld [vmem:[#allocation9] sm:$0xff]   ;;  %v1180_v25 = vld [vmem:[#allocation9 + $0x8] sm:$0xff]  }
  0x52   :  { %1071 = vmatpush3.bf16.msra.mxu1 %v1172_v8  ;;  %v1181_v26 = vld [vmem:[#allocation9 + $0x10] sm:$0xff]   ;;  %v1182_v27 = vld [vmem:[#allocation9 + $0x18] sm:$0xff]   ;;  %v1183_v28 = vld [vmem:[#allocation9 + $0x20] sm:$0xff]  }
  0x53   :  { %1041 = vmatpush3.bf16.msra.mxu0 %v1157_v2  ;;  %1072 = vmatprep.subr.bf16.mxu1 %v1173_v10  ;;  %v1184_v29 = vld [vmem:[#allocation9 + $0x28] sm:$0xff]   ;;  %v1185_v54 = vld [vmem:[#allocation9 + $0x30] sm:$0xff]   ;;  %v1186_v55 = vld [vmem:[#allocation9 + $0x38] sm:$0xff]  }
  0x54   :  { %1042 = vmatprep.subr.bf16.mxu0 %v1158_v3  ;;  %v891_v56 = vld [vmem:[%s1445_s3] ss:$0 sm:$0xff] }
  0x56   :  { %1073 = vmatpush3.bf16.msra.mxu1 %v1173_v10 }
  0x57   :  { %1043 = vmatpush3.bf16.msra.mxu0 %v1158_v3  ;;  %1074 = vmatprep.subr.bf16.mxu1 %v1174_v12 }
  0x58   :  { %1044 = vmatprep.subr.bf16.mxu0 %v1159_v5 }
  0x5a   :  { %1075 = vmatpush3.bf16.msra.mxu1 %v1174_v12 }
  0x5b   :  { %1045 = vmatpush3.bf16.msra.mxu0 %v1159_v5  ;;  %1076 = vmatprep.subr.bf16.mxu1 %v1175_v13 }
  0x5c   :  { %1046 = vmatprep.subr.bf16.mxu0 %v1160_v6 }
  0x5e   :  { %1077 = vmatpush3.bf16.msra.mxu1 %v1175_v13 }
  0x5f   :  { %1047 = vmatpush3.bf16.msra.mxu0 %v1160_v6  ;;  %1078 = vmatprep.subr.bf16.mxu1 %v1176_v16 }
  0x60   :  { %1048 = vmatprep.subr.bf16.mxu0 %v1161_v9 }
  0x62   :  { %1079 = vmatpush3.bf16.msra.mxu1 %v1176_v16 }
  0x63   :  { %1049 = vmatpush3.bf16.msra.mxu0 %v1161_v9  ;;  %1080 = vmatprep.subr.bf16.mxu1 %v1177_v17 }
  0x64   :  { %1050 = vmatprep.subr.bf16.mxu0 %v1162_v11 }
  0x66   :  { %1081 = vmatpush3.bf16.msra.mxu1 %v1177_v17 }
  0x67   :  { %1051 = vmatpush3.bf16.msra.mxu0 %v1162_v11  ;;  %1082 = vmatprep.subr.bf16.mxu1 %v1178_v23 }
  0x68   :  { %1100 = vmatprep.subr.bf16.mxu0 %v1179_v24 }
  0x6a   :  { %1053 = vmatmul.mubr.bf16.vlgmr.msra.gmra.mrb[0].mxu0 %v1164_v14  ;;  %1083 = vmatpush3.bf16.msra.mxu1 %v1178_v23 }
  0x6b   :  { %1056 = vmatprep.mubr.bf16.mxu0 %v1165_v15  ;;  %1132 = vmatprep.subr.bf16.mxu1 %v1179_v24 }
  0x6c   :  { %1101 = vmatpush3.bf16.msra.mxu0 %v1179_v24 }
  0x6d   :  { %1102 = vmatprep.subr.bf16.mxu0 %v1180_v25 }
  0x70   :  { %1103 = vmatpush3.bf16.msra.mxu0 %v1180_v25 }
  0x71   :  { %1104 = vmatprep.subr.bf16.mxu0 %v1181_v26 }
  0x72   :  { %1057 = vmatmul.mubr.bf16.gmra.mrb[4].mxu0 %v1166_v18 }
  0x73   :  { %1060 = vmatprep.mubr.bf16.mxu0 %v1167_v19 }
  0x74   :  { %1105 = vmatpush3.bf16.msra.mxu0 %v1181_v26 }
  0x75   :  { %1106 = vmatprep.subr.bf16.mxu0 %v1182_v27 }
  0x78   :  { %1107 = vmatpush3.bf16.msra.mxu0 %v1182_v27 }
  0x79   :  { %1108 = vmatprep.subr.bf16.mxu0 %v1183_v28 }
  0x7a   :  { %1061 = vmatmul.mubr.bf16.gmra.mrb[8].mxu0 %v1168_v20 }
  0x7b   :  { %1064 = vmatprep.mubr.bf16.mxu0 %v1169_v21 }
  0x7c   :  { %1109 = vmatpush3.bf16.msra.mxu0 %v1183_v28 }
  0x7d   :  { %1110 = vmatprep.subr.bf16.mxu0 %v1184_v29 }
  0x80   :  { %1111 = vmatpush3.bf16.msra.mxu0 %v1184_v29 }
  0x81   :  { %1112 = vmatprep.subr.bf16.mxu0 %v1185_v54 }
  0x82   :  { %1065 = vmatmul.mubr.bf16.gmra.mrb[12].mxu0 %v1170_v22 }
  0x84   :  { %1113 = vmatpush3.bf16.msra.mxu0 %v1185_v54 }
  0x85   :  { %1114 = vmatprep.subr.bf16.mxu0 %v1186_v55 }
  0x88   :  { %1115 = vmatpush3.bf16.msra.mxu0 %v1186_v55 }
 0x13d   :  { %v1054_v30 = vpop.f32.mrb[0].mxu0 }
 0x13e   :  { %v278_v31 = vpop.f32.mrb[1].mxu0 }
 0x13f   :  { %v1055_v32 = vpop.f32.mrb[2].mxu0 }
 0x140   :  { %v393_v33 = vpack.c.bf16 %v1055_v32, %v1054_v30  ;;  %v281_v34 = vpop.f32.mrb[3].mxu0 }
 0x141   :  { %v392_v35 = vpack.c.bf16 %v281_v34, %v278_v31 }
 0x143   :  { %1084 = vmatprep.mubr.bf16.mxu1 %v392_v35 }
 0x144   :  { %1085 = vmatmul.mubr.bf16.vlgmr.msra.gmra.mrb[0].mxu1 %v393_v33 }
 0x145   :  { %v1058_v36 = vpop.f32.mrb[4].mxu0  ;;  %1140 = vmatpush3.bf16.msra.mxu1 %v1179_v24 }
 0x146   :  { %v294_v37 = vpop.f32.mrb[5].mxu0  ;;  %1133 = vmatprep.subr.bf16.mxu1 %v1180_v25 }
 0x147   :  { %v1059_v38 = vpop.f32.mrb[6].mxu0 }
 0x148   :  { %v395_v39 = vpack.c.bf16 %v1059_v38, %v1058_v36  ;;  %v297_v40 = vpop.f32.mrb[7].mxu0 }
 0x149   :  { %v394_v41 = vpack.c.bf16 %v297_v40, %v294_v37  ;;  %1141 = vmatpush3.bf16.msra.mxu1 %v1180_v25 }
 0x14a   :  { %1134 = vmatprep.subr.bf16.mxu1 %v1181_v26 }
 0x14b   :  { %1088 = vmatprep.mubr.bf16.mxu1 %v394_v41 }
 0x14c   :  { %1089 = vmatmul.mubr.bf16.gmra.mrb[4].mxu1 %v395_v39 }
 0x14d   :  { %v1062_v42 = vpop.f32.mrb[8].mxu0  ;;  %1142 = vmatpush3.bf16.msra.mxu1 %v1181_v26 }
 0x14e   :  { %v310_v43 = vpop.f32.mrb[9].mxu0  ;;  %1135 = vmatprep.subr.bf16.mxu1 %v1182_v27 }
 0x14f   :  { %v1063_v44 = vpop.f32.mrb[10].mxu0 }
 0x150   :  { %v397_v45 = vpack.c.bf16 %v1063_v44, %v1062_v42  ;;  %v313_v46 = vpop.f32.mrb[11].mxu0 }
 0x151   :  { %v396_v47 = vpack.c.bf16 %v313_v46, %v310_v43  ;;  %1143 = vmatpush3.bf16.msra.mxu1 %v1182_v27 }
 0x152   :  { %1136 = vmatprep.subr.bf16.mxu1 %v1183_v28 }
 0x153   :  { %1092 = vmatprep.mubr.bf16.mxu1 %v396_v47 }
 0x154   :  { %1093 = vmatmul.mubr.bf16.gmra.mrb[8].mxu1 %v397_v45 }
 0x155   :  { %v1066_v48 = vpop.f32.mrb[12].mxu0  ;;  %1144 = vmatpush3.bf16.msra.mxu1 %v1183_v28 }
 0x156   :  { %v326_v49 = vpop.f32.mrb[13].mxu0  ;;  %1137 = vmatprep.subr.bf16.mxu1 %v1184_v29 }
 0x157   :  { %v1067_v50 = vpop.f32.mrb[14].mxu0 }
 0x158   :  { %v399_v51 = vpack.c.bf16 %v1067_v50, %v1066_v48  ;;  %v329_v52 = vpop.f32.mrb[15].mxu0 }
 0x159   :  { %v398_v53 = vpack.c.bf16 %v329_v52, %v326_v49  ;;  %1145 = vmatpush3.bf16.msra.mxu1 %v1184_v29  ;;  %v900_v49 = vld [vmem:[%s1447_s5] ss:$0 sm:$0xff]  ;;  %s1311_s5 = smov [#allocation11]  }
 0x15a   :  { %1138 = vmatprep.subr.bf16.mxu1 %v1185_v54  ;;  %s861_s23 = sshll.u32 %s1311_s5, 4  ;;  %s862_s23 = int_to_ptr.vmem [resolvable:$true] %s861_s23 }
 0x15b   :  { %1096 = vmatprep.mubr.bf16.mxu1 %v398_v53  ;;  %s1275_s25 = scalar_lea.vmem %s862_s23, 1024  ;;  %p1280_p5 = scmp.lt.s32.totalorder %s862_s23, %s862_s23 }
 0x15c   :  { %1097 = vmatmul.mubr.bf16.gmra.mrb[12].mxu1 %v399_v51  ;;  %p1276_p4 = scmp.ne.s32.totalorder %s862_s23, %s1275_s25  ;;  %p1281_p6 = scmp.lt.s32.totalorder %s1275_s25, %s1275_s25 }
 0x15d   :  { %1146 = vmatpush3.bf16.msra.mxu1 %v1185_v54 }
 0x15e   :  { %1139 = vmatprep.subr.bf16.mxu1 %v1186_v55  ;;  %p1282_p7 = por %p1281_p6, %p1280_p5 }
 0x160   :  { %p1283_p8 = pnand %p1282_p7, %p1276_p4 }
 0x161   :  { %1147 = vmatpush3.bf16.msra.mxu1 %v1186_v55 }
 0x217   :  { %v1086_v57 = vpop.f32.mrb[0].mxu1 }
 0x218   :  { %v514_v58 = vadd.f32 %v1086_v57, %v891_v56  ;;  %v505_v59 = vpop.f32.mrb[1].mxu1 }
 0x219   :  { %v506_v60 = vadd.f32 %v891_v56, %v505_v59  ;;  %v1087_v61 = vpop.f32.mrb[2].mxu1 }
 0x21a   :  { %v517_v62 = vadd.f32 %v1087_v61, %v891_v56  ;;  %v508_v63 = vpop.f32.mrb[3].mxu1  ;;  %v570_v1 = vmax.f32 %v514_v58, 0.0 }
 0x21b   :  { %v509_v0 = vadd.f32 %v891_v56, %v508_v63  ;;  %v568_v3 = vmax.f32 %v506_v60, 0.0 }
 0x21c   :  { %v571_v2 = vmax.f32 %v517_v62, 0.0 }
 0x21d   :  { %v569_v4 = vmax.f32 %v509_v0, 0.0 }
 0x21e   :  { %v585_v5 = vpack.c.bf16 %v571_v2, %v570_v1 }
 0x21f   :  { %v584_v6 = vpack.c.bf16 %v569_v4, %v568_v3  ;;  %v1090_v7 = vpop.f32.mrb[4].mxu1 }
 0x220   :  { %v530_v8 = vadd.f32 %v1090_v7, %v891_v56  ;;  %v521_v9 = vpop.f32.mrb[5].mxu1 }
 0x221   :  { %v522_v10 = vadd.f32 %v891_v56, %v521_v9  ;;  %v1091_v11 = vpop.f32.mrb[6].mxu1  ;;  %1116 = vmatprep.mubr.bf16.mxu0 %v584_v6 }
 0x222   :  { %v533_v12 = vadd.f32 %v1091_v11, %v891_v56  ;;  %v524_v13 = vpop.f32.mrb[7].mxu1  ;;  %1117 = vmatmul.mubr.bf16.vlgmr.msra.gmra.mrb[16].mxu0 %v585_v5  ;;  %v574_v15 = vmax.f32 %v530_v8, 0.0 }
 0x223   :  { %v525_v14 = vadd.f32 %v891_v56, %v524_v13  ;;  %v572_v17 = vmax.f32 %v522_v10, 0.0 }
 0x224   :  { %v575_v16 = vmax.f32 %v533_v12, 0.0 }
 0x225   :  { %v573_v18 = vmax.f32 %v525_v14, 0.0 }
 0x226   :  { %v587_v19 = vpack.c.bf16 %v575_v16, %v574_v15 }
 0x227   :  { %v586_v20 = vpack.c.bf16 %v573_v18, %v572_v17  ;;  %v1094_v21 = vpop.f32.mrb[8].mxu1 }
 0x228   :  { %v546_v22 = vadd.f32 %v1094_v21, %v891_v56  ;;  %v537_v23 = vpop.f32.mrb[9].mxu1 }
 0x229   :  { %v538_v24 = vadd.f32 %v891_v56, %v537_v23  ;;  %v1095_v25 = vpop.f32.mrb[10].mxu1  ;;  %1120 = vmatprep.mubr.bf16.mxu0 %v586_v20 }
 0x22a   :  { %v549_v26 = vadd.f32 %v1095_v25, %v891_v56  ;;  %v540_v27 = vpop.f32.mrb[11].mxu1  ;;  %1121 = vmatmul.mubr.bf16.gmra.mrb[20].mxu0 %v587_v19  ;;  %v578_v29 = vmax.f32 %v546_v22, 0.0 }
 0x22b   :  { %v541_v28 = vadd.f32 %v891_v56, %v540_v27  ;;  %v576_v31 = vmax.f32 %v538_v24, 0.0 }
 0x22c   :  { %v579_v30 = vmax.f32 %v549_v26, 0.0 }
 0x22d   :  { %v577_v32 = vmax.f32 %v541_v28, 0.0 }
 0x22e   :  { %v589_v33 = vpack.c.bf16 %v579_v30, %v578_v29 }
 0x22f   :  { %v588_v34 = vpack.c.bf16 %v577_v32, %v576_v31  ;;  %v1098_v35 = vpop.f32.mrb[12].mxu1 }
 0x230   :  { %v562_v36 = vadd.f32 %v1098_v35, %v891_v56  ;;  %v553_v37 = vpop.f32.mrb[13].mxu1 }
 0x231   :  { %v554_v38 = vadd.f32 %v891_v56, %v553_v37  ;;  %v1099_v39 = vpop.f32.mrb[14].mxu1  ;;  %1124 = vmatprep.mubr.bf16.mxu1 %v588_v34 }
 0x232   :  { %v565_v40 = vadd.f32 %v1099_v39, %v891_v56  ;;  %v556_v41 = vpop.f32.mrb[15].mxu1  ;;  %1125 = vmatmul.mubr.bf16.vlgmr.msra.gmra.mrb[16].mxu1 %v589_v33  ;;  %v582_v43 = vmax.f32 %v562_v36, 0.0 }
 0x233   :  { %v557_v42 = vadd.f32 %v891_v56, %v556_v41  ;;  %v580_v45 = vmax.f32 %v554_v38, 0.0 }
 0x234   :  { %v583_v44 = vmax.f32 %v565_v40, 0.0 }
 0x235   :  { %v581_v46 = vmax.f32 %v557_v42, 0.0 }
 0x236   :  { %v591_v47 = vpack.c.bf16 %v583_v44, %v582_v43 }
 0x237   :  { %v590_v48 = vpack.c.bf16 %v581_v46, %v580_v45 }
 0x239   :  { %1128 = vmatprep.mubr.bf16.mxu1 %v590_v48 }
 0x23a   :  { %1129 = vmatmul.mubr.bf16.gmra.mrb[20].mxu1 %v591_v47 }
 0x2f5   :  { %v1118_v50 = vpop.f32.mrb[16].mxu0 }
 0x2f6   :  { %v706_v51 = vadd.f32 %v1118_v50, %v900_v49  ;;  %v697_v52 = vpop.f32.mrb[17].mxu0 }
 0x2f7   :  { %v698_v53 = vadd.f32 %v900_v49, %v697_v52  ;;  %v1119_v54 = vpop.f32.mrb[18].mxu0 }
 0x2f8   :  { %v709_v55 = vadd.f32 %v1119_v54, %v900_v49  ;;  %v700_v57 = vpop.f32.mrb[19].mxu0  ;;  %v762_v58 = vmax.f32 %v706_v51, 0.0 }
 0x2f9   :  { %v701_v56 = vadd.f32 %v900_v49, %v700_v57  ;;  %v760_v60 = vmax.f32 %v698_v53, 0.0 }
 0x2fa   :  { %v763_v59 = vmax.f32 %v709_v55, 0.0 }
 0x2fb   :  { %v761_v61 = vmax.f32 %v701_v56, 0.0 }
 0x2fc   :  { %v949_v62 = vpack.c.bf16 %v763_v59, %v762_v58 }
 0x2fd   :  { %v944_v63 = vpack.c.bf16 %v761_v61, %v760_v60  ;;  %v1122_v0 = vpop.f32.mrb[20].mxu0 }
 0x2fe   :  { %981 = vst [vmem:[#allocation11 + $0x8] sm:$0xff] %v949_v62   ;;  %v722_v1 = vadd.f32 %v1122_v0, %v900_v49  ;;  %v713_v2 = vpop.f32.mrb[21].mxu0 }
 0x2ff   :  { %945 = vst [vmem:[#allocation11] sm:$0xff] %v944_v63   ;;  %v714_v3 = vadd.f32 %v900_v49, %v713_v2  ;;  %v1123_v4 = vpop.f32.mrb[22].mxu0 }
 0x300   :  { %v725_v5 = vadd.f32 %v1123_v4, %v900_v49  ;;  %v716_v6 = vpop.f32.mrb[23].mxu0  ;;  %v766_v8 = vmax.f32 %v722_v1, 0.0 }
 0x301   :  { %v717_v7 = vadd.f32 %v900_v49, %v716_v6  ;;  %v764_v10 = vmax.f32 %v714_v3, 0.0 }
 0x302   :  { %v767_v9 = vmax.f32 %v725_v5, 0.0 }
 0x303   :  { %v765_v11 = vmax.f32 %v717_v7, 0.0 }
 0x304   :  { %v959_v12 = vpack.c.bf16 %v767_v9, %v766_v8 }
 0x305   :  { %v954_v13 = vpack.c.bf16 %v765_v11, %v764_v10  ;;  %v1126_v14 = vpop.f32.mrb[16].mxu1 }
 0x306   :  { %983 = vst [vmem:[#allocation11 + $0x18] sm:$0xff] %v959_v12   ;;  %v738_v15 = vadd.f32 %v1126_v14, %v900_v49  ;;  %v729_v16 = vpop.f32.mrb[17].mxu1 }
 0x307   :  { %982 = vst [vmem:[#allocation11 + $0x10] sm:$0xff] %v954_v13   ;;  %v730_v17 = vadd.f32 %v900_v49, %v729_v16  ;;  %v1127_v18 = vpop.f32.mrb[18].mxu1 }
 0x308   :  { %v741_v19 = vadd.f32 %v1127_v18, %v900_v49  ;;  %v732_v20 = vpop.f32.mrb[19].mxu1  ;;  %v770_v22 = vmax.f32 %v738_v15, 0.0 }
 0x309   :  { %v733_v21 = vadd.f32 %v900_v49, %v732_v20  ;;  %v768_v24 = vmax.f32 %v730_v17, 0.0 }
 0x30a   :  { %v771_v23 = vmax.f32 %v741_v19, 0.0 }
 0x30b   :  { %v769_v25 = vmax.f32 %v733_v21, 0.0 }
 0x30c   :  { %v969_v26 = vpack.c.bf16 %v771_v23, %v770_v22 }
 0x30d   :  { %v964_v27 = vpack.c.bf16 %v769_v25, %v768_v24  ;;  %v1130_v28 = vpop.f32.mrb[20].mxu1 }
 0x30e   :  { %985 = vst [vmem:[#allocation11 + $0x28] sm:$0xff] %v969_v26   ;;  %v754_v29 = vadd.f32 %v1130_v28, %v900_v49  ;;  %v745_v30 = vpop.f32.mrb[21].mxu1 }
 0x30f   :  { %984 = vst [vmem:[#allocation11 + $0x20] sm:$0xff] %v964_v27   ;;  %v746_v31 = vadd.f32 %v900_v49, %v745_v30  ;;  %v1131_v32 = vpop.f32.mrb[22].mxu1 }
 0x310   :  { %v757_v33 = vadd.f32 %v1131_v32, %v900_v49  ;;  %v748_v34 = vpop.f32.mrb[23].mxu1  ;;  %v774_v36 = vmax.f32 %v754_v29, 0.0 }
 0x311   :  { %v749_v35 = vadd.f32 %v900_v49, %v748_v34  ;;  %v772_v38 = vmax.f32 %v746_v31, 0.0 }
 0x312   :  { %v775_v37 = vmax.f32 %v757_v33, 0.0 }
 0x313   :  { %v773_v39 = vmax.f32 %v749_v35, 0.0 }
 0x314   :  { %v979_v40 = vpack.c.bf16 %v775_v37, %v774_v36 }
 0x315   :  { %v974_v41 = vpack.c.bf16 %v773_v39, %v772_v38 }
 0x316   :  { %987 = vst [vmem:[#allocation11 + $0x38] sm:$0xff] %v979_v40  }
 0x317   :  { %986 = vst [vmem:[#allocation11 + $0x30] sm:$0xff] %v974_v41  }
 0x318   :  { %1286 = shalt.err (!%p1283_p8)
}
 0x319   :  { %s1287_s28 = scalar_lea.hbm %s1448_s6, 1024 }
 0x31a   :  { %p1288_p9 = scmp.ne.s32.totalorder %s1448_s6, %s1287_s28  ;;  %p1291_p10 = scmp.lt.u32.totalorder %s1287_s28, %s1448_s6 }
 0x31c   :  { %p1293_p11 = pnand %p1291_p10, %p1288_p9 }
 0x31e   :  { %1296 = shalt.err (!%p1293_p11)
}
 0x31f   :  { %867 = dma.vmem_to_hbm [thread:$0]  %s862_s23, 1024, %s1448_s6, [#allocation5], %s1307_s9, %s1307_s9, %s1308_s10  }
 0x320   :  { %1303 = dma.done.wait [#allocation5], 1024  }
 0x321   :  { %1304 = vsyncadd [#allocation5], 4294966272 }
 0x322   :  { %871 = vsyncpa [#allocation4], 1 }
 0x323   :  { %872 = vsyncpa [#allocation7], 1 }
 0x324   :  { %873 = vsyncpa [#allocation10], 1 }
 0x325   :  { %874 = vsyncpa [#allocation5], 1 }

</bundles_post_ra>
